<compile_context>
chip_gen: v7x
topology: tpu7x:2x2x1
jax: 0.10.0
libtpu: 0.0.40
codegen_flags: <defaults>
</compile_context>

<pallas_src>
import functools
from math import sqrt

import jax
import jax.numpy as jnp
from jax.experimental import pallas as pl
from jax.experimental.pallas import tpu as pltpu

LN_EPS = 1e-5
LANE = 128


def _round_up(v, m):
    return (v + m - 1) // m * m


def _cdiv(a, b):
    return (a + b - 1) // b


def _vmem_budget_bytes(frac=0.8):
    """Generation-aware VMEM budget (v5e/v6e: 128 MiB physical, v7x: 64 MiB/TC)."""
    cap = None
    try:
        cap = getattr(pltpu.get_tpu_info(), "vmem_capacity_bytes", None)
    except Exception:
        cap = None
    if not cap:
        cap = 64 * 1024 * 1024  # conservative fallback (v7x-sized)
    return int(cap * frac)


def _vmem_footprint(tn, th, dp):
    """Rough VMEM byte estimate for one (token tile, hidden tile) configuration."""
    w = 2 * (dp * th + th * dp) * 2          # w1/w2 bf16 tiles, double-buffered
    xo = 2 * 2 * tn * dp * 4                 # x + out f32 tiles, double-buffered
    acc = tn * dp * 4                        # f32 accumulator scratch
    live = tn * th * (4 + 2)                 # live h (f32) + its bf16 MXU copy
    vec = 2 * (th + 3 * dp) * 4              # b1, b2, gamma, beta
    return int(1.1 * (w + xo + acc + live + vec)) + (1 << 20)


def _choose_h_tile(hp, tn, dp, budget):
    """Largest 128-multiple divisor of hp whose footprint fits the budget."""
    for th in range(hp, 0, -LANE):
        if hp % th == 0 and _vmem_footprint(tn, th, dp) <= budget:
            return th
    return LANE


def residual_block_kernel(x_ref, w1_ref, b1_ref, w2_ref, b2_ref,
                          gamma_ref, beta_ref, o_ref, acc_ref, *, inv_d):
    # x_ref: (TN, Dp) f32     w1_ref: (Dp, TH) bf16   b1_ref: (1, TH) f32
    # w2_ref: (TH, Dp) bf16   b2/gamma/beta: (1, Dp) f32
    # acc_ref: (TN, Dp) f32 scratch accumulating linear2 partial sums over H tiles.
    j = pl.program_id(1)

    @pl.when(j == 0)
    def _():
        acc_ref[...] = jnp.zeros_like(acc_ref)

    # linear1 + ReLU on this H tile : bf16 operands on the MXU, f32 accumulation
    h = jnp.dot(x_ref[...].astype(jnp.bfloat16), w1_ref[...],
                preferred_element_type=jnp.float32) + b1_ref[...]
    h = jnp.maximum(h, 0.0)

    # dropout -> identity (eval mode)

    # linear2 partial sum for this H tile
    acc_ref[...] += jnp.dot(h.astype(jnp.bfloat16), w2_ref[...],
                            preferred_element_type=jnp.float32)

    @pl.when(j == pl.num_programs(1) - 1)
    def _():
        # dropout -> identity (eval mode); residual add in f32
        z = acc_ref[...] + b2_ref[...] + x_ref[...]

        # LayerNorm over the true feature width D (padded lanes of z are exactly
        # zero, so one-pass sum / sum-of-squares stats are exact with the true D).
        s = jnp.sum(z, axis=-1, keepdims=True)
        s2 = jnp.sum(z * z, axis=-1, keepdims=True)
        mean = s * inv_d
        var = jnp.maximum(s2 * inv_d - mean * mean, 0.0)
        z_hat = (z - mean) * jax.lax.rsqrt(var + LN_EPS)
        o_ref[...] = (z_hat * gamma_ref[...] + beta_ref[...]).astype(o_ref.dtype)


def prepare_params(w1, b1, w2, b2, gamma, beta):
    """Pad feature axes to lane width and cast weights to bf16 ONCE, outside the
    hot path (avoids re-padding / re-casting Dp*Hp*6 bytes on every call)."""
    D, H = w1.shape
    Dp = _round_up(D, LANE)
    Hp = _round_up(H, LANE)
    return dict(
        D=D, H=H,
        w1=jnp.pad(w1.astype(jnp.float32), ((0, Dp - D), (0, Hp - H))).astype(jnp.bfloat16),
        w2=jnp.pad(w2.astype(jnp.float32), ((0, Hp - H), (0, Dp - D))).astype(jnp.bfloat16),
        b1=jnp.pad(b1.astype(jnp.float32).reshape(1, H), ((0, 0), (0, Hp - H))),
        b2=jnp.pad(b2.astype(jnp.float32).reshape(1, D), ((0, 0), (0, Dp - D))),
        gamma=jnp.pad(gamma.astype(jnp.float32).reshape(1, D), ((0, 0), (0, Dp - D))),
        beta=jnp.pad(beta.astype(jnp.float32).reshape(1, D), ((0, 0), (0, Dp - D))),
    )


def residual_block(x, params, *, tn=512):
    """x: [B, S, D] float32, params from prepare_params(). Returns [B, S, D] float32."""
    B, S, D = x.shape
    assert D == params["D"]
    Dp, Hp = params["w1"].shape
    N = B * S

    # --- token tile selection ------------------------------------------------
    Np0 = _round_up(N, LANE)
    tn = min(tn, Np0)                     # tiny inputs: don't pad 16 rows up to 512
    if Np0 > LANE and _cdiv(Np0, tn) < 2:
        # v7x shards the "parallel" axis across 2 TensorCores: make >= 2 steps
        # whenever there is enough real data to split.
        tn = _round_up(_cdiv(Np0, 2), LANE)

    # --- VMEM-budgeted hidden tile (resident weights when they fit) ----------
    budget = _vmem_budget_bytes()
    th = _choose_h_tile(Hp, tn, Dp, budget)
    while _vmem_footprint(tn, th, Dp) > budget and tn > LANE:
        tn = _round_up(tn // 2, LANE)
        th = _choose_h_tile(Hp, tn, Dp, budget)

    Np = _round_up(N, tn)
    grid = (Np // tn, Hp // th)

    # --- wrapper-side padding only when actually needed ----------------------
    x2 = x.reshape(N, D)
    if x2.dtype != jnp.float32:
        x2 = x2.astype(jnp.float32)
    needs_pad = (Np != N) or (Dp != D)
    if needs_pad:
        x2 = jnp.pad(x2, ((0, Np - N), (0, Dp - D)))

    kernel = functools.partial(residual_block_kernel, inv_d=1.0 / D)

    out = pl.pallas_call(
        kernel,
        out_shape=jax.ShapeDtypeStruct((Np, Dp), jnp.float32),
        grid_spec=pltpu.PrefetchScalarGridSpec(
            num_scalar_prefetch=0,
            grid=grid,
            in_specs=[
                pl.BlockSpec((tn, Dp), lambda i, j: (i, 0)),   # x tile (streamed)
                pl.BlockSpec((Dp, th), lambda i, j: (0, j)),   # w1 column tile
                pl.BlockSpec((1, th), lambda i, j: (0, j)),    # b1 tile
                pl.BlockSpec((th, Dp), lambda i, j: (j, 0)),   # w2 row tile
                pl.BlockSpec((1, Dp), lambda i, j: (0, 0)),    # b2 (resident)
                pl.BlockSpec((1, Dp), lambda i, j: (0, 0)),    # gamma (resident)
                pl.BlockSpec((1, Dp), lambda i, j: (0, 0)),    # beta (resident)
            ],
            out_specs=pl.BlockSpec((tn, Dp), lambda i, j: (i, 0)),
            scratch_shapes=[pltpu.VMEM((tn, Dp), jnp.float32)],
        ),
        compiler_params=pltpu.CompilerParams(
            dimension_semantics=("parallel", "arbitrary"),
            vmem_limit_bytes=budget),
    )(x2, params["w1"], params["b1"], params["w2"], params["b2"],
      params["gamma"], params["beta"])

    if needs_pad:
        out = out[:N, :D]
    return out.reshape(B, S, D)


def init_params(key, input_dim, hidden_dim):
    """Deterministic init mirroring PyTorch nn.Linear defaults
    (uniform +-1/sqrt(fan_in)); LayerNorm gamma=1, beta=0.
    Weights stored as (in_features, out_features)."""
    k1, k2, k3, k4 = jax.random.split(key, 4)
    bound1 = 1.0 / sqrt(input_dim)
    bound2 = 1.0 / sqrt(hidden_dim)
    w1 = jax.random.uniform(k1, (input_dim, hidden_dim), jnp.float32, -bound1, bound1)
    b1 = jax.random.uniform(k2, (1, hidden_dim), jnp.float32, -bound1, bound1)
    w2 = jax.random.uniform(k3, (hidden_dim, input_dim), jnp.float32, -bound2, bound2)
    b2 = jax.random.uniform(k4, (1, input_dim), jnp.float32, -bound2, bound2)
    gamma = jnp.ones((1, input_dim), jnp.float32)
    beta = jnp.zeros((1, input_dim), jnp.float32)
    return w1, b1, w2, b2, gamma, beta


def reference(x, w1, b1, w2, b2, gamma, beta):
    h = jnp.maximum(x @ w1 + b1[0], 0.0)
    y = h @ w2 + b2[0]
    z = y + x
    mean = jnp.mean(z, axis=-1, keepdims=True)
    var = jnp.mean((z - mean) ** 2, axis=-1, keepdims=True)
    return (z - mean) * jax.lax.rsqrt(var + LN_EPS) * gamma[0] + beta[0]


if __name__ == "__main__":
    key = jax.random.PRNGKey(0)
    k_x, k_p = jax.random.split(key)

    batch, seq, input_dim, hidden_dim = 2, 8, 32, 64
    x = jax.random.normal(k_x, (batch, seq, input_dim), jnp.float32)
    raw_params = init_params(k_p, input_dim, hidden_dim)

    # Pad + bf16-cast weights once, outside the hot path.
    params = prepare_params(*raw_params)

    out = residual_block(x, params)
    out = jax.block_until_ready(out)

    ref = reference(x, *raw_params)
    assert out.shape == x.shape and out.dtype == jnp.float32
    # bf16 MXU operands (f32 accumulation) -> relaxed tolerance vs f32 reference
    assert jnp.allclose(out, ref, atol=5e-2, rtol=5e-2), "mismatch vs reference"

    print("KERNEL_OK")
</pallas_src>

<mosaic_0001>
module attributes {stable_mosaic.version = 11 : i64} {
  func.func @residual_block_kernel(%arg0: i32, %arg1: i32, %arg2: memref<128x128xf32, #tpu.memory_space<vmem>>, %arg3: memref<128x128xbf16, #tpu.memory_space<vmem>>, %arg4: memref<1x128xf32, #tpu.memory_space<vmem>>, %arg5: memref<128x128xbf16, #tpu.memory_space<vmem>>, %arg6: memref<1x128xf32, #tpu.memory_space<vmem>>, %arg7: memref<1x128xf32, #tpu.memory_space<vmem>>, %arg8: memref<1x128xf32, #tpu.memory_space<vmem>>, %arg9: memref<128x128xf32, #tpu.memory_space<vmem>>, %arg10: memref<128x128xf32, #tpu.memory_space<vmem>>) attributes {dimension_semantics = [#tpu.dimension_semantics<parallel>, #tpu.dimension_semantics<arbitrary>], iteration_bounds = array<i64: 1, 1>, scalar_prefetch = 0 : i64, scratch_operands = 1 : i64, tpu.core_type = #tpu.core_type<tc>, window_params = [{transform_indices = @transform_0, window_bounds = array<i64: 128, 128>}, {transform_indices = @transform_1, window_bounds = array<i64: 128, 128>}, {transform_indices = @transform_2, window_bounds = array<i64: 1, 128>}, {transform_indices = @transform_3, window_bounds = array<i64: 128, 128>}, {pipeline_mode = #tpu.pipeline_mode<synchronous>, transform_indices = @transform_4, window_bounds = array<i64: 1, 128>}, {pipeline_mode = #tpu.pipeline_mode<synchronous>, transform_indices = @transform_5, window_bounds = array<i64: 1, 128>}, {pipeline_mode = #tpu.pipeline_mode<synchronous>, transform_indices = @transform_6, window_bounds = array<i64: 1, 128>}, {transform_indices = @transform_7, window_bounds = array<i64: 128, 128>}]} {
    %c0_i32 = arith.constant 0 : i32
    %0 = arith.cmpi eq, %arg1, %c0_i32 : i32
    %1 = arith.extui %0 : i1 to i32
    %c0_i32_0 = arith.constant 0 : i32
    %2 = arith.cmpi ne, %1, %c0_i32_0 : i32
    scf.if %2 {
      %cst_16 = arith.constant 0.000000e+00 : f32
      %21 = vector.broadcast %cst_16 : f32 to vector<128x128xf32>
      %c0_17 = arith.constant 0 : index
      %c0_18 = arith.constant 0 : index
      %22 = vector.load %arg10[%c0_17, %c0_18] : memref<128x128xf32, #tpu.memory_space<vmem>>, vector<128x128xf32>
      tpu.vector_store %arg10[%c0_17, %c0_18], %21 {strides = array<i32>} : memref<128x128xf32, #tpu.memory_space<vmem>>, vector<128x128xf32>,
    } else {
    }
    %c0 = arith.constant 0 : index
    %c0_1 = arith.constant 0 : index
    %3 = vector.load %arg2[%c0, %c0_1] : memref<128x128xf32, #tpu.memory_space<vmem>>, vector<128x128xf32>
    %4 = arith.truncf %3 : vector<128x128xf32> to vector<128x128xbf16>
    %c0_2 = arith.constant 0 : index
    %c0_3 = arith.constant 0 : index
    %5 = vector.load %arg3[%c0_2, %c0_3] : memref<128x128xbf16, #tpu.memory_space<vmem>>, vector<128x128xbf16>
    %cst = arith.constant dense<0.000000e+00> : vector<128x128xf32>
    %6 = tpu.matmul %4, %5, %cst {dimension_numbers = #tpu.dot_dimension_numbers<[1], [0], [0], [1], [0, 0, 1, 1], [], []>} : vector<128x128xbf16>, vector<128x128xbf16>, vector<128x128xf32> -> vector<128x128xf32>
    %c0_4 = arith.constant 0 : index
    %c0_5 = arith.constant 0 : index
    %7 = vector.load %arg4[%c0_4, %c0_5] : memref<1x128xf32, #tpu.memory_space<vmem>>, vector<1x128xf32>
    %8 = vector.broadcast %7 : vector<1x128xf32> to vector<128x128xf32>
    %9 = arith.addf %6, %8 : vector<128x128xf32>
    %cst_6 = arith.constant 0.000000e+00 : f32
    %10 = vector.broadcast %cst_6 : f32 to vector<128x128xf32>
    %11 = arith.maximumf %9, %10 : vector<128x128xf32>
    %c0_7 = arith.constant 0 : index
    %c0_8 = arith.constant 0 : index
    %12 = vector.load %arg10[%c0_7, %c0_8] : memref<128x128xf32, #tpu.memory_space<vmem>>, vector<128x128xf32>
    %13 = arith.truncf %11 : vector<128x128xf32> to vector<128x128xbf16>
    %c0_9 = arith.constant 0 : index
    %c0_10 = arith.constant 0 : index
    %14 = vector.load %arg5[%c0_9, %c0_10] : memref<128x128xbf16, #tpu.memory_space<vmem>>, vector<128x128xbf16>
    %cst_11 = arith.constant dense<0.000000e+00> : vector<128x128xf32>
    %15 = tpu.matmul %13, %14, %cst_11 {dimension_numbers = #tpu.dot_dimension_numbers<[1], [0], [0], [1], [0, 0, 1, 1], [], []>} : vector<128x128xbf16>, vector<128x128xbf16>, vector<128x128xf32> -> vector<128x128xf32>
    %16 = arith.addf %12, %15 : vector<128x128xf32>
    %c0_12 = arith.constant 0 : index
    %c0_13 = arith.constant 0 : index
    %17 = vector.load %arg10[%c0_12, %c0_13] : memref<128x128xf32, #tpu.memory_space<vmem>>, vector<128x128xf32>
    tpu.vector_store %arg10[%c0_12, %c0_13], %16 {strides = array<i32>} : memref<128x128xf32, #tpu.memory_space<vmem>>, vector<128x128xf32>,
    %c0_i32_14 = arith.constant 0 : i32
    %18 = arith.cmpi eq, %arg1, %c0_i32_14 : i32
    %19 = arith.extui %18 : i1 to i32
    %c0_i32_15 = arith.constant 0 : i32
    %20 = arith.cmpi ne, %19, %c0_i32_15 : i32
    scf.if %20 {
      %c0_16 = arith.constant 0 : index
      %c0_17 = arith.constant 0 : index
      %21 = vector.load %arg10[%c0_16, %c0_17] : memref<128x128xf32, #tpu.memory_space<vmem>>, vector<128x128xf32>
      %c0_18 = arith.constant 0 : index
      %c0_19 = arith.constant 0 : index
      %22 = vector.load %arg6[%c0_18, %c0_19] : memref<1x128xf32, #tpu.memory_space<vmem>>, vector<1x128xf32>
      %23 = vector.broadcast %22 : vector<1x128xf32> to vector<128x128xf32>
      %24 = arith.addf %21, %23 : vector<128x128xf32>
      %c0_20 = arith.constant 0 : index
      %c0_21 = arith.constant 0 : index
      %25 = vector.load %arg2[%c0_20, %c0_21] : memref<128x128xf32, #tpu.memory_space<vmem>>, vector<128x128xf32>
      %26 = arith.addf %24, %25 : vector<128x128xf32>
      %cst_22 = arith.constant dense<0.000000e+00> : vector<128xf32>
      %27 = vector.multi_reduction <add>, %26, %cst_22 [1] : vector<128x128xf32> to vector<128xf32>
      %28 = vector.shape_cast %27 : vector<128xf32> to vector<128x1xf32>
      %29 = arith.mulf %26, %26 : vector<128x128xf32>
      %cst_23 = arith.constant dense<0.000000e+00> : vector<128xf32>
      %30 = vector.multi_reduction <add>, %29, %cst_23 [1] : vector<128x128xf32> to vector<128xf32>
      %31 = vector.shape_cast %30 : vector<128xf32> to vector<128x1xf32>
      %cst_24 = arith.constant 3.125000e-02 : f32
      %32 = vector.broadcast %cst_24 : f32 to vector<128x1xf32>
      %33 = arith.mulf %28, %32 : vector<128x1xf32>
      %cst_25 = arith.constant 3.125000e-02 : f32
      %34 = vector.broadcast %cst_25 : f32 to vector<128x1xf32>
      %35 = arith.mulf %31, %34 : vector<128x1xf32>
      %36 = arith.mulf %33, %33 : vector<128x1xf32>
      %37 = arith.subf %35, %36 : vector<128x1xf32>
      %cst_26 = arith.constant 0.000000e+00 : f32
      %38 = vector.broadcast %cst_26 : f32 to vector<128x1xf32>
      %39 = arith.maximumf %37, %38 : vector<128x1xf32>
      %40 = vector.broadcast %33 : vector<128x1xf32> to vector<128x128xf32>
      %41 = arith.subf %26, %40 : vector<128x128xf32>
      %cst_27 = arith.constant 9.99999974E-6 : f32
      %42 = vector.broadcast %cst_27 : f32 to vector<128x1xf32>
      %43 = arith.addf %39, %42 : vector<128x1xf32>
      %44 = math.rsqrt %43 : vector<128x1xf32>
      %45 = vector.broadcast %44 : vector<128x1xf32> to vector<128x128xf32>
      %46 = arith.mulf %41, %45 : vector<128x128xf32>
      %c0_28 = arith.constant 0 : index
      %c0_29 = arith.constant 0 : index
      %47 = vector.load %arg7[%c0_28, %c0_29] : memref<1x128xf32, #tpu.memory_space<vmem>>, vector<1x128xf32>
      %48 = vector.broadcast %47 : vector<1x128xf32> to vector<128x128xf32>
      %49 = arith.mulf %46, %48 : vector<128x128xf32>
      %c0_30 = arith.constant 0 : index
      %c0_31 = arith.constant 0 : index
      %50 = vector.load %arg8[%c0_30, %c0_31] : memref<1x128xf32, #tpu.memory_space<vmem>>, vector<1x128xf32>
      %51 = vector.broadcast %50 : vector<1x128xf32> to vector<128x128xf32>
      %52 = arith.addf %49, %51 : vector<128x128xf32>
      %c0_32 = arith.constant 0 : index
      %c0_33 = arith.constant 0 : index
      %53 = vector.load %arg9[%c0_32, %c0_33] : memref<128x128xf32, #tpu.memory_space<vmem>>, vector<128x128xf32>
      tpu.vector_store %arg9[%c0_32, %c0_33], %52 {strides = array<i32>} : memref<128x128xf32, #tpu.memory_space<vmem>>, vector<128x128xf32>,
    } else {
    }
    return
  }
  func.func @transform_0(%arg0: i32, %arg1: i32) -> (i32, i32) {
    %c0_i32 = arith.constant 0 : i32
    %c0_i32_0 = arith.constant 0 : i32
    return %arg0, %c0_i32 : i32, i32
  }
  func.func @transform_1(%arg0: i32, %arg1: i32) -> (i32, i32) {
    %c0_i32 = arith.constant 0 : i32
    %c0_i32_0 = arith.constant 0 : i32
    return %c0_i32, %arg1 : i32, i32
  }
  func.func @transform_2(%arg0: i32, %arg1: i32) -> (i32, i32) {
    %c0_i32 = arith.constant 0 : i32
    %c0_i32_0 = arith.constant 0 : i32
    return %c0_i32, %arg1 : i32, i32
  }
  func.func @transform_3(%arg0: i32, %arg1: i32) -> (i32, i32) {
    %c0_i32 = arith.constant 0 : i32
    %c0_i32_0 = arith.constant 0 : i32
    return %arg1, %c0_i32 : i32, i32
  }
  func.func @transform_4(%arg0: i32, %arg1: i32) -> (i32, i32) {
    %c0_i32 = arith.constant 0 : i32
    %c0_i32_0 = arith.constant 0 : i32
    %c0_i32_1 = arith.constant 0 : i32
    return %c0_i32, %c0_i32_0 : i32, i32
  }
  func.func @transform_5(%arg0: i32, %arg1: i32) -> (i32, i32) {
    %c0_i32 = arith.constant 0 : i32
    %c0_i32_0 = arith.constant 0 : i32
    %c0_i32_1 = arith.constant 0 : i32
    return %c0_i32, %c0_i32_0 : i32, i32
  }
  func.func @transform_6(%arg0: i32, %arg1: i32) -> (i32, i32) {
    %c0_i32 = arith.constant 0 : i32
    %c0_i32_0 = arith.constant 0 : i32
    %c0_i32_1 = arith.constant 0 : i32
    return %c0_i32, %c0_i32_0 : i32, i32
  }
  func.func @transform_7(%arg0: i32, %arg1: i32) -> (i32, i32) {
    %c0_i32 = arith.constant 0 : i32
    %c0_i32_0 = arith.constant 0 : i32
    return %arg0, %c0_i32 : i32, i32
  }
}

</mosaic_0001>

<bundles_post_ra>
// kernel: tpu_custom_call.1
= control target key start
LH: loop header
LB: loop body
LE: loop exit
PB: predicated region body
PF: predicated region fallthrough
CT: control target
= control target key end

     0   :  { %12 = vsyncpa [#allocation4], 0  ;;  %s1552_s0 = inlined_call_operand.hbm [shape: f32[128,128], index: 0, kind: input, shape index: {}]   ;;  %s1553_s1 = inlined_call_operand.hbm [shape: bf16[128,128], index: 1, kind: input, shape index: {}]   ;;  %s1554_s2 = inlined_call_operand.vmem [shape: f32[1,128], index: 2, kind: input, shape index: {}]   ;;  %s1555_s3 = inlined_call_operand.hbm [shape: bf16[128,128], index: 3, kind: input, shape index: {}]   ;;  %s1556_s4 = inlined_call_operand.vmem [shape: f32[1,128], index: 4, kind: input, shape index: {}]   ;;  %s1557_s5 = inlined_call_operand.vmem [shape: f32[1,128], index: 5, kind: input, shape index: {}]   ;;  %s1558_s6 = inlined_call_operand.vmem [shape: f32[1,128], index: 6, kind: input, shape index: {}]   ;;  %s1559_s7 = inlined_call_operand.hbm [shape: f32[128,128], index: 7, kind: output, shape index: {}]  }
   0x1   :  { %13 = vsyncpa [#allocation7], 0 }
   0x2   :  { %14 = vsyncpa [#allocation5], 0  ;;  %s1158_s24 = smov [#allocation6]   ;;  %s1064_s28 = scalar_lea.hbm %s1553_s1, 1024 }
   0x3   :  { %s32_s25 = sshll.u32 %s1158_s24, 4  ;;  %p1065_p0 = scmp.ne.s32.totalorder %s1553_s1, %s1064_s28  ;;  %s33_s25 = int_to_ptr.vmem [resolvable:$true] %s32_s25 }
   0x4   :  { %p1068_p1 = scmp.lt.u32.totalorder %s1064_s28, %s1553_s1 }
   0x6   :  { %p1070_p2 = pnand %p1068_p1, %p1065_p0 }
   0x8   :  { %1073 = shalt.err (!%p1070_p2)
}
   0x9   :  { %s1074_s10 = scalar_lea.vmem %s33_s25, 1024  ;;  %p1079_p4 = scmp.lt.s32.totalorder %s33_s25, %s33_s25 }
   0xa   :  { %p1075_p3 = scmp.ne.s32.totalorder %s33_s25, %s1074_s10  ;;  %p1080_p5 = scmp.lt.s32.totalorder %s1074_s10, %s1074_s10 }
   0xc   :  { %p1081_p6 = por %p1080_p5, %p1079_p4 }
   0xe   :  { %p1082_p7 = pnand %p1081_p6, %p1075_p3 }
  0x10   :  { %1085 = shalt.err (!%p1082_p7)
}
  0x11   :  { %s1159_s11 = smov 64   ;;  %s1160_s12 = smov 4  }
  0x12   :  { %38 = dma.hbm_to_vmem [thread:$0]  %s1553_s1, 1024, %s33_s25, [#allocation7], %s1159_s11, %s1159_s11, %s1160_s12  }
  0x13   :  { %s1161_s15 = smov [#allocation3]   ;;  %s1086_s19 = scalar_lea.hbm %s1552_s0, 2048 }
  0x14   :  { %s20_s16 = sshll.u32 %s1161_s15, 4  ;;  %p1087_p8 = scmp.ne.s32.totalorder %s1552_s0, %s1086_s19  ;;  %s21_s16 = int_to_ptr.vmem [resolvable:$true] %s20_s16 }
  0x15   :  { %p1090_p9 = scmp.lt.u32.totalorder %s1086_s19, %s1552_s0 }
  0x17   :  { %p1092_p10 = pnand %p1090_p9, %p1087_p8 }
  0x19   :  { %1095 = shalt.err (!%p1092_p10)
}
  0x1a   :  { %s1096_s24 = scalar_lea.vmem %s21_s16, 2048  ;;  %p1101_p12 = scmp.lt.s32.totalorder %s21_s16, %s21_s16 }
  0x1b   :  { %p1097_p11 = scmp.ne.s32.totalorder %s21_s16, %s1096_s24  ;;  %p1102_p13 = scmp.lt.s32.totalorder %s1096_s24, %s1096_s24 }
  0x1d   :  { %p1103_p0 = por %p1102_p13, %p1101_p12 }
  0x1f   :  { %p1104_p1 = pnand %p1103_p0, %p1097_p11 }
  0x21   :  { %1107 = shalt.err (!%p1104_p1)
}
  0x22   :  { %s1162_s1 = smov 128   ;;  %s1163_s25 = smov 8  }
  0x23   :  { %26 = dma.hbm_to_vmem [thread:$0]  %s1552_s0, 2048, %s21_s16, [#allocation4], %s1162_s1, %s1162_s1, %s1163_s25  }
  0x24   :  { %s1164_s28 = smov [#allocation8]   ;;  %s1108_s9 = scalar_lea.hbm %s1555_s3, 1024 }
  0x25   :  { %s46_s29 = sshll.u32 %s1164_s28, 4  ;;  %p1109_p2 = scmp.ne.s32.totalorder %s1555_s3, %s1108_s9  ;;  %s47_s29 = int_to_ptr.vmem [resolvable:$true] %s46_s29 }
  0x26   :  { %p1112_p3 = scmp.lt.u32.totalorder %s1108_s9, %s1555_s3 }
  0x28   :  { %p1114_p4 = pnand %p1112_p3, %p1109_p2 }
  0x2a   :  { %1117 = shalt.err (!%p1114_p4)
}
  0x2b   :  { %s1118_s17 = scalar_lea.vmem %s47_s29, 1024  ;;  %p1123_p6 = scmp.lt.s32.totalorder %s47_s29, %s47_s29 }
  0x2c   :  { %p1119_p5 = scmp.ne.s32.totalorder %s47_s29, %s1118_s17  ;;  %p1124_p7 = scmp.lt.s32.totalorder %s1118_s17, %s1118_s17 }
  0x2e   :  { %p1125_p8 = por %p1124_p7, %p1123_p6 }
  0x30   :  { %p1126_p9 = pnand %p1125_p8, %p1119_p5 }
  0x32   :  { %1129 = shalt.err (!%p1126_p9)
}
  0x33   :  { %52 = dma.hbm_to_vmem [thread:$0]  %s1555_s3, 1024, %s47_s29, [#allocation7], %s1159_s11, %s1159_s11, %s1160_s12  }
  0x34   :  { %1152 = dma.done.wait [#allocation4], 2048  }
  0x35   :  { %1153 = vsyncadd [#allocation4], 4294965248 }
  0x36   :  { %1154 = dma.done.wait [#allocation7], 2048  }
  0x37   :  { %1155 = vsyncadd [#allocation7], 4294965248  ;;  %v1016_v0 = vld [vmem:[#allocation6] sm:$0xff]   ;;  %v1017_v1 = vld [vmem:[#allocation6 + $0x8] sm:$0xff]  }
  0x38   :  { %944 = vmatprep.subr.bf16.mxu0 %v1016_v0  ;;  %v1018_v2 = vld [vmem:[#allocation6 + $0x10] sm:$0xff]   ;;  %v1019_v3 = vld [vmem:[#allocation6 + $0x18] sm:$0xff]   ;;  %v1251_v4 = vld [vmem:[#allocation3] sm:$0xff] }
  0x39   :  { %945 = vmatpush3.bf16.msra.mxu0 %v1016_v0  ;;  %v1253_v5 = vld [vmem:[#allocation3 + $0x8] sm:$0xff]  ;;  %v1020_v7 = vld [vmem:[#allocation6 + $0x20] sm:$0xff]   ;;  %v1026_v11 = vld [vmem:[#allocation8 + $0x10] sm:$0xff]  }
  0x3a   :  { %946 = vmatprep.subr.bf16.mxu0 %v1017_v1  ;;  %v105_v6 = vpack.c.bf16 %v1253_v5, %v1251_v4  ;;  %v1024_v8 = vld [vmem:[#allocation8] sm:$0xff]   ;;  %v1025_v9 = vld [vmem:[#allocation8 + $0x8] sm:$0xff]   ;;  %v1022_v12 = vld [vmem:[#allocation6 + $0x30] sm:$0xff]  }
  0x3b   :  { %v1021_v10 = vld [vmem:[#allocation6 + $0x28] sm:$0xff]   ;;  %976 = vmatprep.subr.bf16.mxu1 %v1024_v8  ;;  %v1027_v13 = vld [vmem:[#allocation8 + $0x18] sm:$0xff]   ;;  %v1028_v15 = vld [vmem:[#allocation8 + $0x20] sm:$0xff]  }
  0x3c   :  { %960 = vmatprep.mubr.bf16.mxu0 %v105_v6  ;;  %977 = vmatpush3.bf16.msra.mxu1 %v1024_v8  ;;  %v1023_v14 = vld [vmem:[#allocation6 + $0x38] sm:$0xff]   ;;  %v1257_v16 = vld [vmem:[#allocation3 + $0x10] sm:$0xff]  ;;  %v1261_v18 = vld [vmem:[#allocation3 + $0x20] sm:$0xff] }
  0x3d   :  { %947 = vmatpush3.bf16.msra.mxu0 %v1017_v1  ;;  %978 = vmatprep.subr.bf16.mxu1 %v1025_v9  ;;  %v1259_v17 = vld [vmem:[#allocation3 + $0x18] sm:$0xff]  ;;  %v1263_v19 = vld [vmem:[#allocation3 + $0x28] sm:$0xff]  ;;  %v1269_v23 = vld [vmem:[#allocation3 + $0x30] sm:$0xff] }
  0x3e   :  { %948 = vmatprep.subr.bf16.mxu0 %v1018_v2  ;;  %v106_v20 = vpack.c.bf16 %v1259_v17, %v1257_v16  ;;  %v1029_v21 = vld [vmem:[#allocation8 + $0x28] sm:$0xff]   ;;  %v107_v22 = vpack.c.bf16 %v1263_v19, %v1261_v18  ;;  %v1271_v24 = vld [vmem:[#allocation3 + $0x38] sm:$0xff]  ;;  %v1273_v25 = vld [vmem:[#allocation3 + $0x40] sm:$0xff] }
  0x3f   :  { %v1275_v26 = vld [vmem:[#allocation3 + $0x48] sm:$0xff]  ;;  %v108_v27 = vpack.c.bf16 %v1271_v24, %v1269_v23  ;;  %v1281_v29 = vld [vmem:[#allocation3 + $0x50] sm:$0xff]  ;;  %v1283_v30 = vld [vmem:[#allocation3 + $0x58] sm:$0xff] }
  0x40   :  { %979 = vmatpush3.bf16.msra.mxu1 %v1025_v9  ;;  %v109_v28 = vpack.c.bf16 %v1275_v26, %v1273_v25  ;;  %v1285_v31 = vld [vmem:[#allocation3 + $0x60] sm:$0xff]  ;;  %v1287_v32 = vld [vmem:[#allocation3 + $0x68] sm:$0xff]  ;;  %v110_v33 = vpack.c.bf16 %v1283_v30, %v1281_v29  ;;  %v1293_v35 = vld [vmem:[#allocation3 + $0x70] sm:$0xff] }
  0x41   :  { %949 = vmatpush3.bf16.msra.mxu0 %v1018_v2  ;;  %980 = vmatprep.subr.bf16.mxu1 %v1026_v11  ;;  %v111_v34 = vpack.c.bf16 %v1287_v32, %v1285_v31  ;;  %v1295_v36 = vld [vmem:[#allocation3 + $0x78] sm:$0xff]  ;;  %v1030_v38 = vld [vmem:[#allocation8 + $0x30] sm:$0xff]   ;;  %v892_v40 = vld [vmem:[%s1554_s2] ss:$0 sm:$0xff] }
  0x42   :  { %950 = vmatprep.subr.bf16.mxu0 %v1019_v3  ;;  %v112_v37 = vpack.c.bf16 %v1295_v36, %v1293_v35  ;;  %v1031_v39 = vld [vmem:[#allocation8 + $0x38] sm:$0xff]  }
  0x44   :  { %981 = vmatpush3.bf16.msra.mxu1 %v1026_v11 }
  0x45   :  { %951 = vmatpush3.bf16.msra.mxu0 %v1019_v3  ;;  %982 = vmatprep.subr.bf16.mxu1 %v1027_v13 }
  0x46   :  { %952 = vmatprep.subr.bf16.mxu0 %v1020_v7 }
  0x48   :  { %983 = vmatpush3.bf16.msra.mxu1 %v1027_v13 }
  0x49   :  { %953 = vmatpush3.bf16.msra.mxu0 %v1020_v7  ;;  %984 = vmatprep.subr.bf16.mxu1 %v1028_v15 }
  0x4a   :  { %954 = vmatprep.subr.bf16.mxu0 %v1021_v10 }
  0x4c   :  { %985 = vmatpush3.bf16.msra.mxu1 %v1028_v15 }
  0x4d   :  { %955 = vmatpush3.bf16.msra.mxu0 %v1021_v10  ;;  %986 = vmatprep.subr.bf16.mxu1 %v1029_v21 }
  0x4e   :  { %956 = vmatprep.subr.bf16.mxu0 %v1022_v12 }
  0x50   :  { %987 = vmatpush3.bf16.msra.mxu1 %v1029_v21 }
  0x51   :  { %957 = vmatpush3.bf16.msra.mxu0 %v1022_v12  ;;  %988 = vmatprep.subr.bf16.mxu1 %v1030_v38 }
  0x52   :  { %958 = vmatprep.subr.bf16.mxu0 %v1023_v14 }
  0x54   :  { %989 = vmatpush3.bf16.msra.mxu1 %v1030_v38 }
  0x55   :  { %959 = vmatpush3.bf16.msra.mxu0 %v1023_v14  ;;  %990 = vmatprep.subr.bf16.mxu1 %v1031_v39 }
  0x58   :  { %961 = vmatmul.mubr.bf16.vlgmr.msra.gmra.mrb[0].mxu0 %v106_v20  ;;  %991 = vmatpush3.bf16.msra.mxu1 %v1031_v39 }
  0x59   :  { %964 = vmatprep.mubr.bf16.mxu0 %v107_v22 }
  0x60   :  { %965 = vmatmul.mubr.bf16.gmra.mrb[4].mxu0 %v108_v27 }
  0x61   :  { %968 = vmatprep.mubr.bf16.mxu0 %v109_v28 }
  0x68   :  { %969 = vmatmul.mubr.bf16.gmra.mrb[8].mxu0 %v110_v33 }
  0x69   :  { %972 = vmatprep.mubr.bf16.mxu0 %v111_v34 }
  0x70   :  { %973 = vmatmul.mubr.bf16.gmra.mrb[12].mxu0 %v112_v37 }
 0x12b   :  { %v962_v41 = vpop.f32.mrb[0].mxu0 }
 0x12c   :  { %v227_v42 = vadd.f32 %v962_v41, %v892_v40  ;;  %v218_v43 = vpop.f32.mrb[1].mxu0 }
 0x12d   :  { %v219_v44 = vadd.f32 %v892_v40, %v218_v43  ;;  %v963_v45 = vpop.f32.mrb[2].mxu0 }
 0x12e   :  { %v230_v46 = vadd.f32 %v963_v45, %v892_v40  ;;  %v221_v47 = vpop.f32.mrb[3].mxu0  ;;  %v283_v49 = vmax.f32 %v227_v42, 0.0 }
 0x12f   :  { %v222_v48 = vadd.f32 %v892_v40, %v221_v47  ;;  %v281_v51 = vmax.f32 %v219_v44, 0.0 }
 0x130   :  { %v284_v50 = vmax.f32 %v230_v46, 0.0 }
 0x131   :  { %v282_v52 = vmax.f32 %v222_v48, 0.0 }
 0x132   :  { %v314_v53 = vpack.c.bf16 %v284_v50, %v283_v49  ;;  %v1305_v50 = vld [vmem:[%s1556_s4] ss:$0 sm:$0xff] }
 0x133   :  { %v966_v54 = vpop.f32.mrb[4].mxu0  ;;  %v313_v55 = vpack.c.bf16 %v282_v52, %v281_v51 }
 0x134   :  { %v243_v56 = vadd.f32 %v966_v54, %v892_v40  ;;  %v234_v57 = vpop.f32.mrb[5].mxu0 }
 0x135   :  { %v235_v58 = vadd.f32 %v892_v40, %v234_v57  ;;  %v967_v59 = vpop.f32.mrb[6].mxu0  ;;  %992 = vmatprep.mubr.bf16.mxu1 %v313_v55 }
 0x136   :  { %v287_v60 = vmax.f32 %v243_v56, 0.0  ;;  %v246_v61 = vadd.f32 %v967_v59, %v892_v40  ;;  %v237_v62 = vpop.f32.mrb[7].mxu0  ;;  %993 = vmatmul.mubr.bf16.vlgmr.msra.gmra.mrb[0].mxu1 %v314_v53 }
 0x137   :  { %v285_v63 = vmax.f32 %v235_v58, 0.0  ;;  %v238_v0 = vadd.f32 %v892_v40, %v237_v62 }
 0x138   :  { %v288_v1 = vmax.f32 %v246_v61, 0.0 }
 0x139   :  { %v286_v2 = vmax.f32 %v238_v0, 0.0 }
 0x13a   :  { %v316_v3 = vpack.c.bf16 %v288_v1, %v287_v60 }
 0x13b   :  { %v315_v6 = vpack.c.bf16 %v286_v2, %v285_v63  ;;  %v970_v7 = vpop.f32.mrb[8].mxu0 }
 0x13c   :  { %v259_v8 = vadd.f32 %v970_v7, %v892_v40  ;;  %v250_v9 = vpop.f32.mrb[9].mxu0 }
 0x13d   :  { %996 = vmatprep.mubr.bf16.mxu1 %v315_v6  ;;  %v251_v10 = vadd.f32 %v892_v40, %v250_v9  ;;  %v971_v11 = vpop.f32.mrb[10].mxu0 }
 0x13e   :  { %997 = vmatmul.mubr.bf16.gmra.mrb[4].mxu1 %v316_v3  ;;  %v291_v12 = vmax.f32 %v259_v8, 0.0  ;;  %v262_v13 = vadd.f32 %v971_v11, %v892_v40  ;;  %v253_v14 = vpop.f32.mrb[11].mxu0 }
 0x13f   :  { %v289_v15 = vmax.f32 %v251_v10, 0.0  ;;  %v254_v20 = vadd.f32 %v892_v40, %v253_v14 }
 0x140   :  { %v292_v21 = vmax.f32 %v262_v13, 0.0 }
 0x141   :  { %v290_v22 = vmax.f32 %v254_v20, 0.0 }
 0x142   :  { %v318_v27 = vpack.c.bf16 %v292_v21, %v291_v12 }
 0x143   :  { %v317_v28 = vpack.c.bf16 %v290_v22, %v289_v15  ;;  %v974_v33 = vpop.f32.mrb[12].mxu0 }
 0x144   :  { %v275_v34 = vadd.f32 %v974_v33, %v892_v40  ;;  %v266_v37 = vpop.f32.mrb[13].mxu0 }
 0x145   :  { %1000 = vmatprep.mubr.bf16.mxu1 %v317_v28  ;;  %v267_v38 = vadd.f32 %v892_v40, %v266_v37  ;;  %v975_v39 = vpop.f32.mrb[14].mxu0 }
 0x146   :  { %1001 = vmatmul.mubr.bf16.gmra.mrb[8].mxu1 %v318_v27  ;;  %v295_v41 = vmax.f32 %v275_v34, 0.0  ;;  %v278_v42 = vadd.f32 %v975_v39, %v892_v40  ;;  %v269_v43 = vpop.f32.mrb[15].mxu0 }
 0x147   :  { %v293_v44 = vmax.f32 %v267_v38, 0.0  ;;  %v270_v45 = vadd.f32 %v892_v40, %v269_v43 }
 0x148   :  { %v296_v46 = vmax.f32 %v278_v42, 0.0 }
 0x149   :  { %v294_v47 = vmax.f32 %v270_v45, 0.0 }
 0x14a   :  { %v320_v48 = vpack.c.bf16 %v296_v46, %v295_v41 }
 0x14b   :  { %v319_v49 = vpack.c.bf16 %v294_v47, %v293_v44 }
 0x14d   :  { %1004 = vmatprep.mubr.bf16.mxu1 %v319_v49 }
 0x14e   :  { %1005 = vmatmul.mubr.bf16.gmra.mrb[12].mxu1 %v320_v48 }
 0x209   :  { %v994_v51 = vpop.f32.mrb[0].mxu1 }
 0x20a   :  { %v542_v52 = vadd.f32 %v994_v51, %v1305_v50  ;;  %v419_v53 = vpop.f32.mrb[1].mxu1 }
 0x20b   :  { %v540_v54 = vadd.f32 %v1305_v50, %v419_v53  ;;  %v995_v55 = vpop.f32.mrb[2].mxu1 }
 0x20c   :  { %v1310_v40 = vadd.f32 %v542_v52, %v1257_v16  ;;  %v543_v56 = vadd.f32 %v995_v55, %v1305_v50  ;;  %v422_v57 = vpop.f32.mrb[3].mxu1 }
 0x20d   :  { %v1314_v58 = vadd.f32 %v540_v54, %v1251_v4  ;;  %v541_v60 = vadd.f32 %v1305_v50, %v422_v57 }
 0x20e   :  { %592 = vadd.xlane.f32.xlu1 %v1310_v40  ;;  %v1319_v59 = vadd.f32 %v543_v56, %v1259_v17  ;;  %v622_v16 = vmul.f32 %v1310_v40, %v1310_v40 }
 0x20f   :  { %588 = vadd.xlane.f32.xlu0 %v1314_v58  ;;  %v1326_v4 = vadd.f32 %v541_v60, %v1253_v5  ;;  %v620_v6 = vmul.f32 %v1314_v58, %v1314_v58 }
 0x210   :  { %v623_v1 = vmul.f32 %v1319_v59, %v1319_v59 }
 0x211   :  { %v998_v61 = vpop.f32.mrb[4].mxu1  ;;  %v621_v2 = vmul.f32 %v1326_v4, %v1326_v4 }
 0x212   :  { %594 = vadd.xlane.f32.xlu1 %v1319_v59  ;;  %v435_v62 = vpop.f32.mrb[5].mxu1  ;;  %v546_v3 = vadd.f32 %v998_v61, %v1305_v50 }
 0x213   :  { %640 = vadd.xlane.f32.xlu0 %v622_v16  ;;  %v999_v63 = vpop.f32.mrb[6].mxu1  ;;  %v544_v13 = vadd.f32 %v1305_v50, %v435_v62 }
 0x214   :  { %v438_v0 = vpop.f32.mrb[7].mxu1  ;;  %v547_v17 = vadd.f32 %v999_v63, %v1305_v50  ;;  %v1342_v12 = vadd.f32 %v546_v3, %v1269_v23 }
 0x215   :  { %v545_v10 = vadd.f32 %v1305_v50, %v438_v0  ;;  %v1351_v15 = vadd.f32 %v544_v13, %v1261_v18 }
 0x216   :  { %642 = vadd.xlane.f32.xlu1 %v623_v1  ;;  %v1338_v9 = vadd.f32 %v547_v17, %v1271_v24  ;;  %v626_v27 = vmul.f32 %v1342_v12, %v1342_v12 }
 0x217   :  { %590 = vadd.xlane.f32.xlu0 %v1326_v4  ;;  %v1348_v14 = vadd.f32 %v545_v10, %v1263_v19  ;;  %v624_v33 = vmul.f32 %v1351_v15, %v1351_v15 }
 0x218   :  { %v627_v21 = vmul.f32 %v1338_v9, %v1338_v9 }
 0x219   :  { %v1002_v7 = vpop.f32.mrb[8].mxu1  ;;  %v625_v18 = vmul.f32 %v1348_v14, %v1348_v14 }
 0x21a   :  { %638 = vadd.xlane.f32.xlu1 %v621_v2  ;;  %v451_v5 = vpop.f32.mrb[9].mxu1  ;;  %v550_v28 = vadd.f32 %v1002_v7, %v1305_v50 }
 0x21b   :  { %636 = vadd.xlane.f32.xlu0 %v620_v6  ;;  %v1003_v8 = vpop.f32.mrb[10].mxu1  ;;  %v548_v39 = vadd.f32 %v1305_v50, %v451_v5 }
 0x21c   :  { %v454_v11 = vpop.f32.mrb[11].mxu1  ;;  %v551_v19 = vadd.f32 %v1003_v8, %v1305_v50  ;;  %v1370_v38 = vadd.f32 %v550_v28, %v1281_v29 }
 0x21d   :  { %v549_v37 = vadd.f32 %v1305_v50, %v454_v11  ;;  %v1379_v42 = vadd.f32 %v548_v39, %v1273_v25 }
 0x21e   :  { %602 = vadd.xlane.f32.xlu1 %v1338_v9  ;;  %v1366_v34 = vadd.f32 %v551_v19, %v1283_v30  ;;  %v630_v30 = vmul.f32 %v1370_v38, %v1370_v38 }
 0x21f   :  { %600 = vadd.xlane.f32.xlu0 %v1342_v12  ;;  %v1376_v41 = vadd.f32 %v549_v37, %v1275_v26  ;;  %v628_v44 = vmul.f32 %v1379_v42, %v1379_v42 }
 0x220   :  { %v631_v29 = vmul.f32 %v1366_v34, %v1366_v34 }
 0x221   :  { %v1006_v24 = vpop.f32.mrb[12].mxu1  ;;  %v629_v26 = vmul.f32 %v1376_v41, %v1376_v41 }
 0x222   :  { %598 = vadd.xlane.f32.xlu1 %v1348_v14  ;;  %v467_v20 = vpop.f32.mrb[13].mxu1  ;;  %v554_v25 = vadd.f32 %v1006_v24, %v1305_v50 }
 0x223   :  { %596 = vadd.xlane.f32.xlu0 %v1351_v15  ;;  %v1007_v23 = vpop.f32.mrb[14].mxu1  ;;  %v552_v48 = vadd.f32 %v1305_v50, %v467_v20 }
 0x224   :  { %v470_v22 = vpop.f32.mrb[15].mxu1  ;;  %v555_v43 = vadd.f32 %v1007_v23, %v1305_v50  ;;  %v1398_v47 = vadd.f32 %v554_v25, %v1293_v35  ;;  %v1435_v25 = vld [vmem:[%s1557_s5] ss:$0 sm:$0xff]  ;;  %s1165_s5 = smov [#allocation9]  }
 0x225   :  { %v553_v46 = vadd.f32 %v1305_v50, %v470_v22  ;;  %v1407_v51 = vadd.f32 %v552_v48, %v1285_v31 }
 0x226   :  { %650 = vadd.xlane.f32.xlu1 %v627_v21  ;;  %v1394_v45 = vadd.f32 %v555_v43, %v1295_v36 }
 0x227   :  { %648 = vadd.xlane.f32.xlu0 %v626_v27  ;;  %v1404_v49 = vadd.f32 %v553_v46, %v1287_v32  ;;  %v632_v36 = vmul.f32 %v1407_v51, %v1407_v51  ;;  %v634_v32 = vmul.f32 %v1398_v47, %v1398_v47 }
 0x228   :  { %v635_v50 = vmul.f32 %v1394_v45, %v1394_v45 }
 0x229   :  { %v633_v35 = vmul.f32 %v1404_v49, %v1404_v49 }
 0x22a   :  { %646 = vadd.xlane.f32.xlu1 %v625_v18 }
 0x22b   :  { %644 = vadd.xlane.f32.xlu0 %v624_v33 }
 0x22e   :  { %610 = vadd.xlane.f32.xlu1 %v1366_v34 }
 0x22f   :  { %608 = vadd.xlane.f32.xlu0 %v1370_v38 }
 0x232   :  { %606 = vadd.xlane.f32.xlu1 %v1376_v41 }
 0x233   :  { %604 = vadd.xlane.f32.xlu0 %v1379_v42 }
 0x236   :  { %658 = vadd.xlane.f32.xlu1 %v631_v29 }
 0x237   :  { %656 = vadd.xlane.f32.xlu0 %v630_v30 }
 0x23a   :  { %654 = vadd.xlane.f32.xlu1 %v629_v26 }
 0x23b   :  { %652 = vadd.xlane.f32.xlu0 %v628_v44 }
 0x23e   :  { %618 = vadd.xlane.f32.xlu1 %v1394_v45 }
 0x23f   :  { %616 = vadd.xlane.f32.xlu0 %v1398_v47 }
 0x242   :  { %614 = vadd.xlane.f32.xlu1 %v1404_v49 }
 0x243   :  { %612 = vadd.xlane.f32.xlu0 %v1407_v51 }
 0x246   :  { %662 = vadd.xlane.f32.xlu1 %v633_v35 }
 0x247   :  { %660 = vadd.xlane.f32.xlu0 %v632_v36 }
 0x24a   :  { %666 = vadd.xlane.f32.xlu1 %v635_v50 }
 0x24b   :  { %664 = vadd.xlane.f32.xlu0 %v634_v32 }
 0x29b   :  { %v593_v31 = vpop.xlane.xlu1 %592 }
 0x29c   :  { %v589_v52 = vpop.xlane.xlu0 %588  ;;  %v670_v53 = vmul.f32 0.03125, %v593_v31 }
 0x29d   :  { %v1419_v1 = vmul.f32 0.03125, %v589_v52 }
 0x29e   :  { %v702_v57 = vmul.f32 %v670_v53, %v670_v53  ;;  %v750_v43 = vsub.f32 %v1310_v40, %v670_v53  ;;  %v1445_v40 = vld [vmem:[%s1558_s6] ss:$0 sm:$0xff]  ;;  %s879_s6 = sshll.u32 %s1165_s5, 4  ;;  %s880_s6 = int_to_ptr.vmem [resolvable:$true] %s879_s6 }
 0x29f   :  { %v595_v54 = vpop.xlane.xlu1 %594  ;;  %v700_v13 = vmul.f32 %v1419_v1, %v1419_v1  ;;  %s1130_s21 = scalar_lea.vmem %s880_s6, 2048  ;;  %p1135_p11 = scmp.lt.s32.totalorder %s880_s6, %s880_s6 }
 0x2a0   :  { %v671_v55 = vmul.f32 0.03125, %v595_v54  ;;  %v641_v56 = vpop.xlane.xlu0 %640  ;;  %p1131_p10 = scmp.ne.s32.totalorder %s880_s6, %s1130_s21  ;;  %p1136_p12 = scmp.lt.s32.totalorder %s1130_s21, %s1130_s21 }
 0x2a1   :  { %v686_v60 = vmul.f32 0.03125, %v641_v56 }
 0x2a2   :  { %v703_v62 = vmul.f32 %v671_v55, %v671_v55  ;;  %v751_v32 = vsub.f32 %v1319_v59, %v671_v55  ;;  %p1137_p13 = por %p1136_p12, %p1135_p11 }
 0x2a3   :  { %v718_v61 = vsub.f32 %v686_v60, %v702_v57  ;;  %v643_v16 = vpop.xlane.xlu1 %642 }
 0x2a4   :  { %v687_v63 = vmul.f32 0.03125, %v643_v16  ;;  %v591_v0 = vpop.xlane.xlu0 %590  ;;  %p1138_p0 = pnand %p1137_p13, %p1131_p10 }
 0x2a5   :  { %v734_v17 = vmax.f32 %v718_v61, 0.0  ;;  %v1421_v2 = vmul.f32 0.03125, %v591_v0 }
 0x2a6   :  { %v719_v3 = vsub.f32 %v687_v63, %v703_v62 }
 0x2a7   :  { %v766_v6 = vadd.f32 1e-05, %v734_v17  ;;  %v701_v7 = vmul.f32 %v1421_v2, %v1421_v2  ;;  %v639_v5 = vpop.xlane.xlu1 %638  ;;  %v749_v61 = vsub.f32 %v1326_v4, %v1421_v2  ;;  %v748_v4 = vsub.f32 %v1314_v58, %v1419_v1 }
 0x2a8   :  { %v735_v8 = vmax.f32 %v719_v3, 0.0  ;;  %v685_v10 = vmul.f32 0.03125, %v639_v5  ;;  %v637_v11 = vpop.xlane.xlu0 %636 }
 0x2a9   :  { %1032 = vrsqrt.f32 %v766_v6  ;;  %v684_v24 = vmul.f32 0.03125, %v637_v11 }
 0x2aa   :  { %v767_v20 = vadd.f32 1e-05, %v735_v8  ;;  %v717_v23 = vsub.f32 %v685_v10, %v701_v7 }
 0x2ab   :  { %v716_v21 = vsub.f32 %v684_v24, %v700_v13  ;;  %v603_v22 = vpop.xlane.xlu1 %602 }
 0x2ac   :  { %1034 = vrsqrt.f32 %v767_v20  ;;  %v733_v27 = vmax.f32 %v717_v23, 0.0  ;;  %v601_v19 = vpop.xlane.xlu0 %600  ;;  %v1427_v39 = vmul.f32 0.03125, %v603_v22 }
 0x2ad   :  { %v732_v18 = vmax.f32 %v716_v21, 0.0  ;;  %v1429_v30 = vmul.f32 0.03125, %v601_v19 }
 0x2ae   :  { %v765_v28 = vadd.f32 1e-05, %v733_v27  ;;  %v707_v48 = vmul.f32 %v1427_v39, %v1427_v39 }
 0x2af   :  { %v764_v33 = vadd.f32 1e-05, %v732_v18  ;;  %v599_v37 = vpop.xlane.xlu1 %598  ;;  %v706_v31 = vmul.f32 %v1429_v30, %v1429_v30 }
 0x2b0   :  { %1036 = vrsqrt.f32 %v765_v28  ;;  %v597_v29 = vpop.xlane.xlu0 %596  ;;  %v1439_v35 = vmul.f32 0.03125, %v599_v37 }
 0x2b1   :  { %1038 = vrsqrt.f32 %v764_v33  ;;  %v1449_v52 = vmul.f32 0.03125, %v597_v29 }
 0x2b2   :  { %v705_v62 = vmul.f32 %v1439_v35, %v1439_v35 }
 0x2b3   :  { %v1033_v26 = vpop.eup %1032  ;;  %v651_v44 = vpop.xlane.xlu1 %650  ;;  %v704_v6 = vmul.f32 %v1449_v52, %v1449_v52 }
 0x2b4   :  { %v798_v46 = vmul.f32 %v1033_v26, %v750_v43  ;;  %v691_v36 = vmul.f32 0.03125, %v651_v44  ;;  %v649_v50 = vpop.xlane.xlu0 %648 }
 0x2b5   :  { %v690_v53 = vmul.f32 0.03125, %v649_v50 }
 0x2b6   :  { %v1035_v54 = vpop.eup %1034  ;;  %v821_v56 = vmul.f32 %v1435_v25, %v798_v46  ;;  %v723_v57 = vsub.f32 %v691_v36, %v707_v48 }
 0x2b7   :  { %v799_v60 = vmul.f32 %v1035_v54, %v751_v32  ;;  %v722_v59 = vsub.f32 %v690_v53, %v706_v31  ;;  %v647_v55 = vpop.xlane.xlu1 %646  ;;  %v755_v53 = vsub.f32 %v1338_v9, %v1427_v39 }
 0x2b8   :  { %v844_v16 = vadd.f32 %v1445_v40, %v821_v56  ;;  %v739_v63 = vmax.f32 %v723_v57, 0.0  ;;  %v689_v0 = vmul.f32 0.03125, %v647_v55  ;;  %v645_v17 = vpop.xlane.xlu0 %644 }
 0x2b9   :  { %v822_v3 = vmul.f32 %v1435_v25, %v799_v60  ;;  %v738_v7 = vmax.f32 %v722_v59, 0.0  ;;  %v688_v5 = vmul.f32 0.03125, %v645_v17 }
 0x2ba   :  { %v1037_v8 = vpop.eup %1036  ;;  %860 = vst [vmem:[#allocation9 + $0x10] sm:$0xff] %v844_v16  ;;  %v771_v2 = vadd.f32 1e-05, %v739_v63  ;;  %v721_v10 = vsub.f32 %v689_v0, %v705_v62  ;;  %v753_v16 = vsub.f32 %v1348_v14, %v1439_v35  ;;  %v752_v14 = vsub.f32 %v1351_v15, %v1449_v52 }
 0x2bb   :  { %v1039_v11 = vpop.eup %1038  ;;  %v845_v13 = vadd.f32 %v1445_v40, %v822_v3  ;;  %v797_v24 = vmul.f32 %v1037_v8, %v749_v61  ;;  %v770_v20 = vadd.f32 1e-05, %v738_v7  ;;  %v720_v23 = vsub.f32 %v688_v5, %v704_v6  ;;  %v611_v21 = vpop.xlane.xlu1 %610 }
 0x2bc   :  { %v796_v22 = vmul.f32 %v1039_v11, %v748_v4  ;;  %1040 = vrsqrt.f32 %v771_v2  ;;  %v737_v27 = vmax.f32 %v721_v10, 0.0  ;;  %v609_v19 = vpop.xlane.xlu0 %608  ;;  %v1467_v26 = vmul.f32 0.03125, %v611_v21 }
 0x2bd   :  { %861 = vst [vmem:[#allocation9 + $0x18] sm:$0xff] %v845_v13  ;;  %v820_v18 = vmul.f32 %v1435_v25, %v797_v24  ;;  %1042 = vrsqrt.f32 %v770_v20  ;;  %v736_v28 = vmax.f32 %v720_v23, 0.0  ;;  %v1469_v46 = vmul.f32 0.03125, %v609_v19 }
 0x2be   :  { %v819_v58 = vmul.f32 %v1435_v25, %v796_v22  ;;  %v769_v1 = vadd.f32 1e-05, %v737_v27  ;;  %v711_v36 = vmul.f32 %v1467_v26, %v1467_v26  ;;  %v754_v61 = vsub.f32 %v1342_v12, %v1429_v30 }
 0x2bf   :  { %v843_v33 = vadd.f32 %v1445_v40, %v820_v18  ;;  %v768_v37 = vadd.f32 1e-05, %v736_v28  ;;  %v607_v29 = vpop.xlane.xlu1 %606  ;;  %v710_v54 = vmul.f32 %v1469_v46, %v1469_v46 }
 0x2c0   :  { %v842_v43 = vadd.f32 %v1445_v40, %v819_v58  ;;  %1044 = vrsqrt.f32 %v769_v1  ;;  %v605_v44 = vpop.xlane.xlu0 %604  ;;  %v1473_v50 = vmul.f32 0.03125, %v607_v29 }
 0x2c1   :  { %859 = vst [vmem:[#allocation9 + $0x8] sm:$0xff] %v843_v33  ;;  %1046 = vrsqrt.f32 %v768_v37  ;;  %v1479_v56 = vmul.f32 0.03125, %v605_v44 }
 0x2c2   :  { %858 = vst [vmem:[#allocation9] sm:$0xff] %v842_v43  ;;  %v709_v9 = vmul.f32 %v1473_v50, %v1473_v50 }
 0x2c3   :  { %v659_v48 = vpop.xlane.xlu1 %658  ;;  %v708_v12 = vmul.f32 %v1479_v56, %v1479_v56 }
 0x2c4   :  { %v695_v32 = vmul.f32 0.03125, %v659_v48  ;;  %v657_v31 = vpop.xlane.xlu0 %656 }
 0x2c5   :  { %v694_v57 = vmul.f32 0.03125, %v657_v31 }
 0x2c6   :  { %v1041_v60 = vpop.eup %1040  ;;  %v727_v59 = vsub.f32 %v695_v32, %v711_v36 }
 0x2c7   :  { %v1043_v55 = vpop.eup %1042  ;;  %v803_v62 = vmul.f32 %v1041_v60, %v755_v53  ;;  %v726_v63 = vsub.f32 %v694_v57, %v710_v54  ;;  %v655_v0 = vpop.xlane.xlu1 %654  ;;  %v759_v54 = vsub.f32 %v1366_v34, %v1467_v26 }
 0x2c8   :  { %v802_v17 = vmul.f32 %v1043_v55, %v754_v61  ;;  %v743_v39 = vmax.f32 %v727_v59, 0.0  ;;  %v693_v3 = vmul.f32 0.03125, %v655_v0  ;;  %v653_v6 = vpop.xlane.xlu0 %652  ;;  %v758_v55 = vsub.f32 %v1370_v38, %v1469_v46 }
 0x2c9   :  { %v826_v7 = vmul.f32 %v1435_v25, %v803_v62  ;;  %v742_v30 = vmax.f32 %v726_v63, 0.0  ;;  %v692_v5 = vmul.f32 0.03125, %v653_v6  ;;  %v757_v63 = vsub.f32 %v1376_v41, %v1473_v50 }
 0x2ca   :  { %v1045_v8 = vpop.eup %1044  ;;  %v825_v35 = vmul.f32 %v1435_v25, %v802_v17  ;;  %v775_v4 = vadd.f32 1e-05, %v743_v39  ;;  %v725_v2 = vsub.f32 %v693_v3, %v709_v9  ;;  %v756_v41 = vsub.f32 %v1379_v42, %v1479_v56 }
 0x2cb   :  { %v1047_v10 = vpop.eup %1046  ;;  %v849_v11 = vadd.f32 %v1445_v40, %v826_v7  ;;  %v801_v13 = vmul.f32 %v1045_v8, %v753_v16  ;;  %v774_v24 = vadd.f32 1e-05, %v742_v30  ;;  %v724_v20 = vsub.f32 %v692_v5, %v708_v12  ;;  %v619_v23 = vpop.xlane.xlu1 %618 }
 0x2cc   :  { %v848_v21 = vadd.f32 %v1445_v40, %v825_v35  ;;  %v800_v22 = vmul.f32 %v1047_v10, %v752_v14  ;;  %1048 = vrsqrt.f32 %v775_v4  ;;  %v741_v27 = vmax.f32 %v725_v2, 0.0  ;;  %v617_v19 = vpop.xlane.xlu0 %616 }
 0x2cd   :  { %865 = vst [vmem:[#allocation9 + $0x38] sm:$0xff] %v849_v11  ;;  %v824_v15 = vmul.f32 %v1435_v25, %v801_v13  ;;  %1050 = vrsqrt.f32 %v774_v24  ;;  %v740_v52 = vmax.f32 %v724_v20, 0.0  ;;  %v1499_v36 = vmul.f32 0.03125, %v619_v23 }
 0x2ce   :  { %864 = vst [vmem:[#allocation9 + $0x30] sm:$0xff] %v848_v21  ;;  %v823_v18 = vmul.f32 %v1435_v25, %v800_v22  ;;  %v773_v28 = vadd.f32 1e-05, %v741_v27  ;;  %v1503_v57 = vmul.f32 0.03125, %v617_v19 }
 0x2cf   :  { %v847_v58 = vadd.f32 %v1445_v40, %v824_v15  ;;  %v772_v1 = vadd.f32 1e-05, %v740_v52  ;;  %v615_v33 = vpop.xlane.xlu1 %614  ;;  %v715_v34 = vmul.f32 %v1499_v36, %v1499_v36 }
 0x2d0   :  { %v846_v37 = vadd.f32 %v1445_v40, %v823_v18  ;;  %1052 = vrsqrt.f32 %v773_v28  ;;  %v613_v29 = vpop.xlane.xlu0 %612  ;;  %v681_v43 = vmul.f32 0.03125, %v615_v33  ;;  %v714_v38 = vmul.f32 %v1503_v57, %v1503_v57 }
 0x2d1   :  { %863 = vst [vmem:[#allocation9 + $0x28] sm:$0xff] %v847_v58  ;;  %1054 = vrsqrt.f32 %v772_v1  ;;  %v680_v44 = vmul.f32 0.03125, %v613_v29  ;;  %v763_v1 = vsub.f32 %v1394_v45, %v1499_v36  ;;  %v762_v29 = vsub.f32 %v1398_v47, %v1503_v57 }
 0x2d2   :  { %862 = vst [vmem:[#allocation9 + $0x20] sm:$0xff] %v846_v37  ;;  %v713_v32 = vmul.f32 %v681_v43, %v681_v43  ;;  %v761_v19 = vsub.f32 %v1404_v49, %v681_v43 }
 0x2d3   :  { %v663_v48 = vpop.xlane.xlu1 %662  ;;  %v712_v60 = vmul.f32 %v680_v44, %v680_v44  ;;  %v760_v52 = vsub.f32 %v1407_v51, %v680_v44 }
 0x2d4   :  { %v697_v31 = vmul.f32 0.03125, %v663_v48  ;;  %v661_v53 = vpop.xlane.xlu0 %660 }
 0x2d5   :  { %v696_v61 = vmul.f32 0.03125, %v661_v53 }
 0x2d6   :  { %v1049_v59 = vpop.eup %1048  ;;  %v729_v16 = vsub.f32 %v697_v31, %v713_v32 }
 0x2d7   :  { %v1051_v62 = vpop.eup %1050  ;;  %v807_v0 = vmul.f32 %v1049_v59, %v759_v54  ;;  %v728_v17 = vsub.f32 %v696_v61, %v712_v60  ;;  %v667_v9 = vpop.xlane.xlu1 %666 }
 0x2d8   :  { %v806_v39 = vmul.f32 %v1051_v62, %v758_v55  ;;  %v745_v26 = vmax.f32 %v729_v16, 0.0  ;;  %v699_v3 = vmul.f32 0.03125, %v667_v9  ;;  %v665_v6 = vpop.xlane.xlu0 %664 }
 0x2d9   :  { %v830_v7 = vmul.f32 %v1435_v25, %v807_v0  ;;  %v744_v46 = vmax.f32 %v728_v17, 0.0  ;;  %v698_v12 = vmul.f32 0.03125, %v665_v6 }
 0x2da   :  { %v1053_v30 = vpop.eup %1052  ;;  %v829_v50 = vmul.f32 %v1435_v25, %v806_v39  ;;  %v777_v5 = vadd.f32 1e-05, %v745_v26  ;;  %v731_v8 = vsub.f32 %v699_v3, %v715_v34 }
 0x2db   :  { %v1055_v14 = vpop.eup %1054  ;;  %v853_v35 = vadd.f32 %v1445_v40, %v830_v7  ;;  %v805_v4 = vmul.f32 %v1053_v30, %v757_v63  ;;  %v776_v2 = vadd.f32 1e-05, %v744_v46  ;;  %v730_v10 = vsub.f32 %v698_v12, %v714_v38 }
 0x2dc   :  { %v852_v11 = vadd.f32 %v1445_v40, %v829_v50  ;;  %v804_v13 = vmul.f32 %v1055_v14, %v756_v41  ;;  %1056 = vrsqrt.f32 %v777_v5  ;;  %v747_v24 = vmax.f32 %v731_v8, 0.0 }
 0x2dd   :  { %869 = vst [vmem:[#allocation9 + $0x58] sm:$0xff] %v853_v35  ;;  %v828_v20 = vmul.f32 %v1435_v25, %v805_v4  ;;  %1058 = vrsqrt.f32 %v776_v2  ;;  %v746_v42 = vmax.f32 %v730_v10, 0.0 }
 0x2de   :  { %868 = vst [vmem:[#allocation9 + $0x50] sm:$0xff] %v852_v11  ;;  %v827_v56 = vmul.f32 %v1435_v25, %v804_v13  ;;  %v779_v23 = vadd.f32 1e-05, %v747_v24 }
 0x2df   :  { %v851_v21 = vadd.f32 %v1445_v40, %v828_v20  ;;  %v778_v22 = vadd.f32 1e-05, %v746_v42 }
 0x2e0   :  { %v850_v27 = vadd.f32 %v1445_v40, %v827_v56  ;;  %1060 = vrsqrt.f32 %v779_v23 }
 0x2e1   :  { %867 = vst [vmem:[#allocation9 + $0x48] sm:$0xff] %v851_v21  ;;  %1062 = vrsqrt.f32 %v778_v22 }
 0x2e2   :  { %866 = vst [vmem:[#allocation9 + $0x40] sm:$0xff] %v850_v27 }
 0x2e6   :  { %v1057_v15 = vpop.eup %1056 }
 0x2e7   :  { %v1059_v18 = vpop.eup %1058  ;;  %v809_v28 = vmul.f32 %v1057_v15, %v761_v19 }
 0x2e8   :  { %v808_v58 = vmul.f32 %v1059_v18, %v760_v52 }
 0x2e9   :  { %v832_v33 = vmul.f32 %v1435_v25, %v809_v28 }
 0x2ea   :  { %v1061_v37 = vpop.eup %1060  ;;  %v831_v48 = vmul.f32 %v1435_v25, %v808_v58 }
 0x2eb   :  { %v1063_v32 = vpop.eup %1062  ;;  %v855_v49 = vadd.f32 %v1445_v40, %v832_v33  ;;  %v811_v43 = vmul.f32 %v1061_v37, %v763_v1 }
 0x2ec   :  { %v854_v51 = vadd.f32 %v1445_v40, %v831_v48  ;;  %v810_v44 = vmul.f32 %v1063_v32, %v762_v29 }
 0x2ed   :  { %871 = vst [vmem:[#allocation9 + $0x68] sm:$0xff] %v855_v49  ;;  %v834_v31 = vmul.f32 %v1435_v25, %v811_v43 }
 0x2ee   :  { %870 = vst [vmem:[#allocation9 + $0x60] sm:$0xff] %v854_v51  ;;  %v833_v45 = vmul.f32 %v1435_v25, %v810_v44 }
 0x2ef   :  { %v857_v36 = vadd.f32 %v1445_v40, %v834_v31 }
 0x2f0   :  { %v856_v47 = vadd.f32 %v1445_v40, %v833_v45 }
 0x2f1   :  { %873 = vst [vmem:[#allocation9 + $0x78] sm:$0xff] %v857_v36 }
 0x2f2   :  { %872 = vst [vmem:[#allocation9 + $0x70] sm:$0xff] %v856_v47 }
 0x2f3   :  { %1141 = shalt.err (!%p1138_p0)
}
 0x2f4   :  { %s1142_s24 = scalar_lea.hbm %s1559_s7, 2048 }
 0x2f5   :  { %p1143_p1 = scmp.ne.s32.totalorder %s1559_s7, %s1142_s24  ;;  %p1146_p2 = scmp.lt.u32.totalorder %s1142_s24, %s1559_s7 }
 0x2f7   :  { %p1148_p3 = pnand %p1146_p2, %p1143_p1 }
 0x2f9   :  { %1151 = shalt.err (!%p1148_p3)
}
 0x2fa   :  { %885 = dma.vmem_to_hbm [thread:$0]  %s880_s6, 2048, %s1559_s7, [#allocation5], %s1162_s1, %s1162_s1, %s1163_s25  }
 0x2fb   :  { %1156 = dma.done.wait [#allocation5], 2048  }
 0x2fc   :  { %1157 = vsyncadd [#allocation5], 4294965248 }
 0x2fd   :  { %889 = vsyncpa [#allocation4], 1 }
 0x2fe   :  { %890 = vsyncpa [#allocation7], 1 }
 0x2ff   :  { %891 = vsyncpa [#allocation5], 1 }

</bundles_post_ra>
